<compile_context>
chip_gen: v5e
topology: v5e:2x2
jax: 0.10.0
libtpu: 0.0.40
codegen_flags: <defaults>
</compile_context>

<pallas_src>
import jax
import jax.numpy as jnp
from jax.experimental import pallas as pl
from jax.experimental.pallas import tpu as pltpu


def adapter_kernel(x_ref, w1_ref, b1_ref, w2_ref, b2_ref, o_ref):
    x = x_ref[...]                                    # native dtype (f32 or bf16)
    # down-projection (MXU, f32 accumulate) + bias + ReLU in f32
    h = jnp.dot(x, w1_ref[...], preferred_element_type=jnp.float32) + b1_ref[...]
    h = jnp.maximum(h, 0.0)
    # up-projection: feed the MXU in the weight dtype (bf16 when weights are bf16)
    y = jnp.dot(h.astype(w2_ref.dtype), w2_ref[...],
                preferred_element_type=jnp.float32) + b2_ref[...]
    # residual add in f32 (safe on v5e: no bf16 VALU), single cast on the store.
    # TODO(synk): if profiling shows VALU-bound on v6e/v7x, do the residual add in bf16.
    o_ref[...] = (y + x.astype(jnp.float32)).astype(o_ref.dtype)


def _round_up(v, m):
    return ((v + m - 1) // m) * m


def _vmem_capacity_bytes():
    try:
        return int(pltpu.get_tpu_info().vmem_capacity_bytes)
    except Exception:
        return 64 << 20   # v7x per-TC VMEM: a safe lower bound on every generation


_MIN_GRID_STEPS = 8        # keep both v7x TensorCores fed + enough pipeline depth
_MAX_TILE_ROWS = 2048      # beyond ~1024 rows/tile the HBM roofline is saturated


def _footprint_bytes(tm, H_pad, Hb_pad, io_itemsize, w_itemsize, x_bufs, weight_bufs):
    io = tm * H_pad * io_itemsize * (x_bufs + 2)                 # x (N-deep) + out (2-deep)
    weights = weight_bufs * (2 * H_pad * Hb_pad * w_itemsize     # W1 + W2
                             + (H_pad + Hb_pad) * 4)             # f32 biases
    scratch = tm * Hb_pad * 4 + tm * H_pad * 4                   # f32 h / y temporaries
    return io + weights + scratch


def _choose_tm(rows, H_pad, Hb_pad, io_itemsize, w_itemsize,
               x_bufs, weight_bufs, budget):
    rows8 = _round_up(rows, 8)
    # MXU/sublane-friendly candidates, largest first (multiples of 256 preferred).
    cands = [2048, 1792, 1536, 1280, 1024, 768, 512, 256, 128, 64, 32, 16, 8]
    cands = [min(c, rows8, _MAX_TILE_ROWS) for c in cands]
    # For big slabs, keep >= _MIN_GRID_STEPS grid steps (v7x megacore) without
    # letting tiles drop below 512 rows.
    if rows8 >= _MIN_GRID_STEPS * 512:
        cap = _round_up(pl.cdiv(rows, _MIN_GRID_STEPS), 256)
        cands = [min(c, cap) for c in cands]
    for tm in dict.fromkeys(cands):
        if _footprint_bytes(tm, H_pad, Hb_pad, io_itemsize, w_itemsize,
                            x_bufs, weight_bufs) <= budget:
            return tm
    # TODO(synk): weights alone exceed the VMEM budget (very large H) -- stream W2
    # column tiles via a second grid axis instead of keeping them resident.
    return 8


def adapter_forward(x, w1, b1, w2, b2, *, skip_adapter=False, io_dtype=None):
    """x: [batch, seq, hidden]; w1: [H, Hb]; b1: [Hb]; w2: [Hb, H]; b2: [H]."""
    if skip_adapter:
        return x

    B, S, H = x.shape
    Hb = w1.shape[1]
    rows = B * S
    io_dtype = jnp.dtype(io_dtype) if io_dtype is not None else x.dtype
    x2d = x.reshape(rows, H).astype(io_dtype)

    # --- zero-pad hidden & bottleneck to lane-dense multiples of 128 (same math) ---
    H_pad = _round_up(H, 128)
    Hb_pad = _round_up(Hb, 128)
    w1p = jnp.pad(w1, ((0, H_pad - H), (0, Hb_pad - Hb)))
    w2p = jnp.pad(w2, ((0, Hb_pad - Hb), (0, H_pad - H)))
    b1p = jnp.pad(b1, ((0, Hb_pad - Hb),)).reshape(1, Hb_pad).astype(jnp.float32)
    b2p = jnp.pad(b2, ((0, H_pad - H),)).reshape(1, H_pad).astype(jnp.float32)
    if H_pad != H:
        x2d = jnp.pad(x2d, ((0, 0), (0, H_pad - H)))

    # TODO(synk): optional fp8 (v7x) / int8 (v6e) weight storage with scales folded
    # into the f32 epilogue would halve resident-weight VMEM further.

    vmem_cap = _vmem_capacity_bytes()
    budget = int(vmem_cap * 0.75)      # leave headroom for Mosaic-internal scratch

    def run(use_pipeline_modes):
        weight_bufs = 1 if use_pipeline_modes else 2
        # 3-deep x buffering only in the memory-bound regime (small bottleneck).
        x_bufs = 3 if (use_pipeline_modes and Hb_pad <= 256) else 2

        io_itm = io_dtype.itemsize
        w_itm = jnp.dtype(w1p.dtype).itemsize
        tm = _choose_tm(rows, H_pad, Hb_pad, io_itm, w_itm,
                        x_bufs, weight_bufs, budget)
        grid = (pl.cdiv(rows, tm),)

        footprint = _footprint_bytes(tm, H_pad, Hb_pad, io_itm, w_itm,
                                     x_bufs, weight_bufs)
        vmem_limit = int(min(vmem_cap,
                             max(32 << 20, int(footprint * 1.5) + (4 << 20))))

        def w_spec(shape):
            if use_pipeline_modes:
                return pl.BlockSpec(shape, lambda i: (0, 0),
                                    pipeline_mode=pl.Buffered(1))
            return pl.BlockSpec(shape, lambda i: (0, 0))

        if use_pipeline_modes and x_bufs != 2:
            x_spec = pl.BlockSpec((tm, H_pad), lambda i: (i, 0),
                                  pipeline_mode=pl.Buffered(x_bufs))
        else:
            x_spec = pl.BlockSpec((tm, H_pad), lambda i: (i, 0))

        cost = pl.CostEstimate(
            flops=4 * rows * H_pad * Hb_pad,
            bytes_accessed=2 * rows * H_pad * io_itm + 2 * H_pad * Hb_pad * w_itm,
            transcendentals=0,
        )

        return pl.pallas_call(
            adapter_kernel,
            out_shape=jax.ShapeDtypeStruct((rows, H_pad), io_dtype),
            grid_spec=pltpu.PrefetchScalarGridSpec(
                num_scalar_prefetch=0,
                grid=grid,
                in_specs=[
                    x_spec,                                  # x tile (pipelined)
                    w_spec((H_pad, Hb_pad)),                 # W1 (resident, 1 buffer)
                    w_spec((1, Hb_pad)),                     # b1 (resident)
                    w_spec((Hb_pad, H_pad)),                 # W2 (resident, 1 buffer)
                    w_spec((1, H_pad)),                      # b2 (resident)
                ],
                out_specs=pl.BlockSpec((tm, H_pad), lambda i: (i, 0)),
            ),
            compiler_params=pltpu.CompilerParams(
                dimension_semantics=("parallel",),  # row tiles independent -> megacore
                vmem_limit_bytes=vmem_limit,
            ),
            cost_estimate=cost,
        )(x2d, w1p, b1p, w2p, b2p)

    try:
        out2d = run(use_pipeline_modes=True)
    except Exception:
        # pl.Buffered pipeline modes not accepted by this build/backend:
        # retry with default double-buffering (identical math).
        out2d = run(use_pipeline_modes=False)

    if H_pad != H:
        out2d = out2d[:, :H]
    return out2d.reshape(B, S, H)


def init_adapter_params(key, input_size, reduction_factor, std=0.01):
    """Matches AdapterLayer.init_weights: normal(std) clamped to [-2*std, 2*std]."""
    bottleneck = input_size // reduction_factor
    k1, k2, k3, k4 = jax.random.split(key, 4)
    clip = lambda a: jnp.clip(a, -2 * std, 2 * std)
    # stored as [in, out] (transpose of torch's [out, in]); same distribution.
    w1 = clip(std * jax.random.normal(k1, (input_size, bottleneck), jnp.float32))
    b1 = clip(std * jax.random.normal(k2, (bottleneck,), jnp.float32))
    w2 = clip(std * jax.random.normal(k3, (bottleneck, input_size), jnp.float32))
    b2 = clip(std * jax.random.normal(k4, (input_size,), jnp.float32))
    return w1, b1, w2, b2


if __name__ == "__main__":
    batch, seq, hidden = 2, 8, 32
    reduction_factor = 4

    key = jax.random.PRNGKey(0)
    kx, kp = jax.random.split(key)
    x = jax.random.normal(kx, (batch, seq, hidden), jnp.float32)
    w1, b1, w2, b2 = init_adapter_params(kp, hidden, reduction_factor)

    # --- f32 path: tight check against plain-JAX reference ---
    out = adapter_forward(x, w1, b1, w2, b2)
    out = jax.block_until_ready(out)

    x2d = x.reshape(-1, hidden)
    h_ref = jnp.maximum(x2d @ w1 + b1, 0.0)
    ref = (h_ref @ w2 + b2 + x2d).reshape(batch, seq, hidden)
    assert jnp.allclose(out, ref, atol=1e-5, rtol=1e-5)

    # --- bf16 I/O + bf16 weights (the fast configuration): loose check vs f32 ref ---
    out_bf16 = adapter_forward(
        x, w1.astype(jnp.bfloat16), b1, w2.astype(jnp.bfloat16), b2,
        io_dtype=jnp.bfloat16,
    )
    out_bf16 = jax.block_until_ready(out_bf16)
    assert jnp.allclose(out_bf16.astype(jnp.float32), ref, atol=1e-1)

    # skip_adapter path (identity)
    out_skip = adapter_forward(x, w1, b1, w2, b2, skip_adapter=True)
    assert jnp.allclose(out_skip, x)

    print("KERNEL_OK")
</pallas_src>

<mosaic_0001>
module attributes {stable_mosaic.version = 11 : i64} {
  func.func @adapter_kernel(%arg0: i32, %arg1: memref<16x128xf32, #tpu.memory_space<vmem>>, %arg2: memref<128x128xf32, #tpu.memory_space<vmem>>, %arg3: memref<1x128xf32, #tpu.memory_space<vmem>>, %arg4: memref<128x128xf32, #tpu.memory_space<vmem>>, %arg5: memref<1x128xf32, #tpu.memory_space<vmem>>, %arg6: memref<16x128xf32, #tpu.memory_space<vmem>>) attributes {dimension_semantics = [#tpu.dimension_semantics<parallel>], iteration_bounds = array<i64: 1>, scalar_prefetch = 0 : i64, scratch_operands = 0 : i64, tpu.core_type = #tpu.core_type<tc>, window_params = [{transform_indices = @transform_0, window_bounds = array<i64: 16, 128>}, {pipeline_mode = #tpu.pipeline_mode<synchronous>, transform_indices = @transform_1, window_bounds = array<i64: 128, 128>}, {pipeline_mode = #tpu.pipeline_mode<synchronous>, transform_indices = @transform_2, window_bounds = array<i64: 1, 128>}, {pipeline_mode = #tpu.pipeline_mode<synchronous>, transform_indices = @transform_3, window_bounds = array<i64: 128, 128>}, {pipeline_mode = #tpu.pipeline_mode<synchronous>, transform_indices = @transform_4, window_bounds = array<i64: 1, 128>}, {transform_indices = @transform_5, window_bounds = array<i64: 16, 128>}]} {
    %c0 = arith.constant 0 : index
    %c0_0 = arith.constant 0 : index
    %0 = vector.load %arg1[%c0, %c0_0] : memref<16x128xf32, #tpu.memory_space<vmem>>, vector<16x128xf32>
    %c0_1 = arith.constant 0 : index
    %c0_2 = arith.constant 0 : index
    %1 = vector.load %arg2[%c0_1, %c0_2] : memref<128x128xf32, #tpu.memory_space<vmem>>, vector<128x128xf32>
    %cst = arith.constant dense<0.000000e+00> : vector<16x128xf32>
    %2 = tpu.matmul %0, %1, %cst {dimension_numbers = #tpu.dot_dimension_numbers<[1], [0], [0], [1], [0, 0, 1, 1], [], []>} : vector<16x128xf32>, vector<128x128xf32>, vector<16x128xf32> -> vector<16x128xf32>
    %c0_3 = arith.constant 0 : index
    %c0_4 = arith.constant 0 : index
    %3 = vector.load %arg3[%c0_3, %c0_4] : memref<1x128xf32, #tpu.memory_space<vmem>>, vector<1x128xf32>
    %4 = vector.broadcast %3 : vector<1x128xf32> to vector<16x128xf32>
    %5 = arith.addf %2, %4 : vector<16x128xf32>
    %cst_5 = arith.constant 0.000000e+00 : f32
    %6 = vector.broadcast %cst_5 : f32 to vector<16x128xf32>
    %7 = arith.maximumf %5, %6 : vector<16x128xf32>
    %c0_6 = arith.constant 0 : index
    %c0_7 = arith.constant 0 : index
    %8 = vector.load %arg4[%c0_6, %c0_7] : memref<128x128xf32, #tpu.memory_space<vmem>>, vector<128x128xf32>
    %cst_8 = arith.constant dense<0.000000e+00> : vector<16x128xf32>
    %9 = tpu.matmul %7, %8, %cst_8 {dimension_numbers = #tpu.dot_dimension_numbers<[1], [0], [0], [1], [0, 0, 1, 1], [], []>} : vector<16x128xf32>, vector<128x128xf32>, vector<16x128xf32> -> vector<16x128xf32>
    %c0_9 = arith.constant 0 : index
    %c0_10 = arith.constant 0 : index
    %10 = vector.load %arg5[%c0_9, %c0_10] : memref<1x128xf32, #tpu.memory_space<vmem>>, vector<1x128xf32>
    %11 = vector.broadcast %10 : vector<1x128xf32> to vector<16x128xf32>
    %12 = arith.addf %9, %11 : vector<16x128xf32>
    %13 = arith.addf %12, %0 : vector<16x128xf32>
    %c0_11 = arith.constant 0 : index
    %c0_12 = arith.constant 0 : index
    %14 = vector.load %arg6[%c0_11, %c0_12] : memref<16x128xf32, #tpu.memory_space<vmem>>, vector<16x128xf32>
    tpu.vector_store %arg6[%c0_11, %c0_12], %13 {strides = array<i32>} : memref<16x128xf32, #tpu.memory_space<vmem>>, vector<16x128xf32>,
    return
  }
  func.func @transform_0(%arg0: i32) -> (i32, i32) {
    %c0_i32 = arith.constant 0 : i32
    %c0_i32_0 = arith.constant 0 : i32
    return %arg0, %c0_i32 : i32, i32
  }
  func.func @transform_1(%arg0: i32) -> (i32, i32) {
    %c0_i32 = arith.constant 0 : i32
    %c0_i32_0 = arith.constant 0 : i32
    %c0_i32_1 = arith.constant 0 : i32
    return %c0_i32, %c0_i32_0 : i32, i32
  }
  func.func @transform_2(%arg0: i32) -> (i32, i32) {
    %c0_i32 = arith.constant 0 : i32
    %c0_i32_0 = arith.constant 0 : i32
    %c0_i32_1 = arith.constant 0 : i32
    return %c0_i32, %c0_i32_0 : i32, i32
  }
  func.func @transform_3(%arg0: i32) -> (i32, i32) {
    %c0_i32 = arith.constant 0 : i32
    %c0_i32_0 = arith.constant 0 : i32
    %c0_i32_1 = arith.constant 0 : i32
    return %c0_i32, %c0_i32_0 : i32, i32
  }
  func.func @transform_4(%arg0: i32) -> (i32, i32) {
    %c0_i32 = arith.constant 0 : i32
    %c0_i32_0 = arith.constant 0 : i32
    %c0_i32_1 = arith.constant 0 : i32
    return %c0_i32, %c0_i32_0 : i32, i32
  }
  func.func @transform_5(%arg0: i32) -> (i32, i32) {
    %c0_i32 = arith.constant 0 : i32
    %c0_i32_0 = arith.constant 0 : i32
    return %arg0, %c0_i32 : i32, i32
  }
}

</mosaic_0001>

<bundles_post_ra>
// kernel: tpu_custom_call.1
= control target key start
LH: loop header
LB: loop body
LE: loop exit
PB: predicated region body
PF: predicated region fallthrough
CT: control target
= control target key end

     0   :  { %10 = vsyncpa [#allocation3], 0  ;;  %s390_s0 = inlined_call_operand.hbm [shape: f32[16,128], index: 0, kind: input, shape index: {}]   ;;  %s391_s1 = inlined_call_operand.hbm [shape: f32[128,128], index: 1, kind: input, shape index: {}]   ;;  %s392_s2 = inlined_call_operand.vmem [shape: f32[1,128], index: 2, kind: input, shape index: {}]   ;;  %s393_s3 = inlined_call_operand.hbm [shape: f32[128,128], index: 3, kind: input, shape index: {}]   ;;  %s394_s4 = inlined_call_operand.vmem [shape: f32[1,128], index: 4, kind: input, shape index: {}]   ;;  %s395_s5 = inlined_call_operand.hbm [shape: f32[16,128], index: 5, kind: output, shape index: {}]  }
   0x1   :  { %11 = vsyncpa [#allocation6], 0 }
   0x2   :  { %12 = vsyncpa [#allocation4], 0  ;;  %s30_s20 = sshll.u32 %s391_s1, 4  ;;  %s324_s21 = smov [#allocation5]   ;;  %s31_s20 = int_to_ptr.hbm [resolvable:$true] %s30_s20 }
   0x3   :  { %s32_s22 = sshll.u32 %s324_s21, 4  ;;  %s17_s25 = sshll.u32 %s390_s0, 4  ;;  %s33_s22 = int_to_ptr.vmem [resolvable:$true] %s32_s22  ;;  %s18_s25 = int_to_ptr.hbm [resolvable:$true] %s17_s25 }
   0x4   :  { %s325_s26 = smov 128   ;;  %s326_s27 = smov 8  }
   0x5   :  { %38 = dma.hbm_to_vmem [thread:$0]  %s31_s20, 2048, %s33_s22, [#allocation6], %s325_s26, %s325_s26, %s326_s27  }
   0x6   :  { %s327_s28 = smov [#allocation2]   ;;  %s45_s1 = sshll.u32 %s393_s3, 4  ;;  %s46_s1 = int_to_ptr.hbm [resolvable:$true] %s45_s1 }
   0x7   :  { %s19_s29 = sshll.u32 %s327_s28, 4  ;;  %s328_s0 = smov [#allocation7]   ;;  %s20_s29 = int_to_ptr.vmem [resolvable:$true] %s19_s29 }
   0x8   :  { %25 = dma.hbm_to_vmem [thread:$0]  %s18_s25, 256, %s20_s29, [#allocation3], %s325_s26, %s325_s26, %s326_s27  }
   0x9   :  { %s47_s7 = sshll.u32 %s328_s0, 4  ;;  %s48_s7 = int_to_ptr.vmem [resolvable:$true] %s47_s7 }
   0xa   :  { %53 = dma.hbm_to_vmem [thread:$0]  %s46_s1, 2048, %s48_s7, [#allocation6], %s325_s26, %s325_s26, %s326_s27  }
   0xb   :  { %318 = dma.done.wait [#allocation3], 256  }
   0xc   :  { %319 = vsyncadd [#allocation3], 4294967040 }
   0xd   :  { %320 = dma.done.wait [#allocation6], 4096  }
   0xe   :  { %321 = vsyncadd [#allocation6], 4294963200  ;;  %v85_v0 = vld [vmem:[#allocation5 + $0x78] sm:$0xff]  ;;  %v84_v1 = vld [vmem:[#allocation5 + $0x70] sm:$0xff]  ;;  %s329_s11 = smov [#allocation8]   ;;  %s168_s14 = sshll.u32 %s395_s5, 4  ;;  %s169_s14 = int_to_ptr.hbm [resolvable:$true] %s168_s14 }
   0xf   :  { %182 = vmatpush.msra.mxu2 %v85_v0  ;;  %90 = vmatpush.msra.mxu0 %v85_v0  ;;  %v83_v2 = vld [vmem:[#allocation5 + $0x68] sm:$0xff]  ;;  %v82_v3 = vld [vmem:[#allocation5 + $0x60] sm:$0xff]  ;;  %v81_v4 = vld [vmem:[#allocation5 + $0x58] sm:$0xff]  ;;  %s166_s12 = sshll.u32 %s329_s11, 4  ;;  %s167_s12 = int_to_ptr.vmem [resolvable:$true] %s166_s12 }
  0x10   :  { %v130_v5 = vld [vmem:[#allocation7 + $0x78] sm:$0xff]  ;;  %v129_v6 = vld [vmem:[#allocation7 + $0x70] sm:$0xff]  ;;  %v128_v8 = vld [vmem:[#allocation7 + $0x68] sm:$0xff] }
  0x11   :  { %183 = vmatpush.msra.mxu2 %v84_v1  ;;  %91 = vmatpush.msra.mxu0 %v84_v1  ;;  %v80_v7 = vld [vmem:[#allocation5 + $0x50] sm:$0xff]  ;;  %v79_v9 = vld [vmem:[#allocation5 + $0x48] sm:$0xff]  ;;  %v127_v10 = vld [vmem:[#allocation7 + $0x60] sm:$0xff] }
  0x12   :  { %198 = vmatpush.msra.mxu3 %v130_v5  ;;  %135 = vmatpush.msra.mxu1 %v130_v5  ;;  %v78_v11 = vld [vmem:[#allocation5 + $0x40] sm:$0xff]  ;;  %v126_v12 = vld [vmem:[#allocation7 + $0x58] sm:$0xff]  ;;  %v125_v14 = vld [vmem:[#allocation7 + $0x50] sm:$0xff] }
  0x13   :  { %184 = vmatpush.msra.mxu2 %v83_v2  ;;  %92 = vmatpush.msra.mxu0 %v83_v2  ;;  %v77_v13 = vld [vmem:[#allocation5 + $0x38] sm:$0xff]  ;;  %v76_v15 = vld [vmem:[#allocation5 + $0x30] sm:$0xff]  ;;  %v124_v16 = vld [vmem:[#allocation7 + $0x48] sm:$0xff] }
  0x14   :  { %199 = vmatpush.msra.mxu3 %v129_v6  ;;  %136 = vmatpush.msra.mxu1 %v129_v6  ;;  %v75_v17 = vld [vmem:[#allocation5 + $0x28] sm:$0xff]  ;;  %v123_v18 = vld [vmem:[#allocation7 + $0x40] sm:$0xff]  ;;  %v122_v20 = vld [vmem:[#allocation7 + $0x38] sm:$0xff] }
  0x15   :  { %185 = vmatpush.msra.mxu2 %v82_v3  ;;  %93 = vmatpush.msra.mxu0 %v82_v3  ;;  %v74_v19 = vld [vmem:[#allocation5 + $0x20] sm:$0xff]  ;;  %v73_v21 = vld [vmem:[#allocation5 + $0x18] sm:$0xff]  ;;  %v121_v22 = vld [vmem:[#allocation7 + $0x30] sm:$0xff] }
  0x16   :  { %200 = vmatpush.msra.mxu3 %v128_v8  ;;  %137 = vmatpush.msra.mxu1 %v128_v8  ;;  %v72_v23 = vld [vmem:[#allocation5 + $0x10] sm:$0xff]  ;;  %v120_v24 = vld [vmem:[#allocation7 + $0x28] sm:$0xff]  ;;  %v119_v26 = vld [vmem:[#allocation7 + $0x20] sm:$0xff] }
  0x17   :  { %186 = vmatpush.msra.mxu2 %v81_v4  ;;  %94 = vmatpush.msra.mxu0 %v81_v4  ;;  %v71_v25 = vld [vmem:[#allocation5 + $0x8] sm:$0xff]  ;;  %v70_v27 = vld [vmem:[#allocation5] sm:$0xff]  ;;  %v69_v28 = vld [vmem:[#allocation2 + $0x8] sm:$0xff] }
  0x18   :  { %201 = vmatpush.msra.mxu3 %v127_v10  ;;  %138 = vmatpush.msra.mxu1 %v127_v10  ;;  %v68_v29 = vld [vmem:[#allocation2] sm:$0xff]  ;;  %v118_v30 = vld [vmem:[#allocation7 + $0x18] sm:$0xff]  ;;  %v116_v32 = vld [vmem:[#allocation7 + $0x8] sm:$0xff] }
  0x19   :  { %187 = vmatpush.msra.mxu2 %v80_v7  ;;  %95 = vmatpush.msra.mxu0 %v80_v7  ;;  %v117_v31 = vld [vmem:[#allocation7 + $0x10] sm:$0xff]  ;;  %v115_v33 = vld [vmem:[#allocation7] sm:$0xff] }
  0x1a   :  { %202 = vmatpush.msra.mxu3 %v126_v12  ;;  %139 = vmatpush.msra.mxu1 %v126_v12  ;;  %v220_v34 = vld [vmem:[%s392_s2] ss:$0 sm:$0xff] }
  0x1b   :  { %188 = vmatpush.msra.mxu2 %v79_v9  ;;  %96 = vmatpush.msra.mxu0 %v79_v9  ;;  %v221_v41 = vld [vmem:[%s394_s4] ss:$0 sm:$0xff] }
  0x1c   :  { %203 = vmatpush.msra.mxu3 %v125_v14  ;;  %140 = vmatpush.msra.mxu1 %v125_v14 }
  0x1d   :  { %189 = vmatpush.msra.mxu2 %v78_v11  ;;  %97 = vmatpush.msra.mxu0 %v78_v11 }
  0x1e   :  { %204 = vmatpush.msra.mxu3 %v124_v16  ;;  %141 = vmatpush.msra.mxu1 %v124_v16 }
  0x1f   :  { %190 = vmatpush.msra.mxu2 %v77_v13  ;;  %98 = vmatpush.msra.mxu0 %v77_v13 }
  0x20   :  { %205 = vmatpush.msra.mxu3 %v123_v18  ;;  %142 = vmatpush.msra.mxu1 %v123_v18 }
  0x21   :  { %191 = vmatpush.msra.mxu2 %v76_v15  ;;  %99 = vmatpush.msra.mxu0 %v76_v15 }
  0x22   :  { %206 = vmatpush.msra.mxu3 %v122_v20  ;;  %143 = vmatpush.msra.mxu1 %v122_v20 }
  0x23   :  { %192 = vmatpush.msra.mxu2 %v75_v17  ;;  %100 = vmatpush.msra.mxu0 %v75_v17 }
  0x24   :  { %207 = vmatpush.msra.mxu3 %v121_v22  ;;  %144 = vmatpush.msra.mxu1 %v121_v22 }
  0x25   :  { %193 = vmatpush.msra.mxu2 %v74_v19  ;;  %101 = vmatpush.msra.mxu0 %v74_v19 }
  0x26   :  { %208 = vmatpush.msra.mxu3 %v120_v24  ;;  %145 = vmatpush.msra.mxu1 %v120_v24 }
  0x27   :  { %194 = vmatpush.msra.mxu2 %v73_v21  ;;  %102 = vmatpush.msra.mxu0 %v73_v21 }
  0x28   :  { %209 = vmatpush.msra.mxu3 %v119_v26  ;;  %146 = vmatpush.msra.mxu1 %v119_v26 }
  0x29   :  { %195 = vmatpush.msra.mxu2 %v72_v23  ;;  %103 = vmatpush.msra.mxu0 %v72_v23 }
  0x2a   :  { %210 = vmatpush.msra.mxu3 %v118_v30  ;;  %147 = vmatpush.msra.mxu1 %v118_v30 }
  0x2b   :  { %196 = vmatpush.msra.mxu2 %v71_v25  ;;  %104 = vmatpush.msra.mxu0 %v71_v25 }
  0x2c   :  { %211 = vmatpush.msra.mxu3 %v117_v31  ;;  %148 = vmatpush.msra.mxu1 %v117_v31 }
  0x2d   :  { %197 = vmatpush.msra.mxu2 %v70_v27  ;;  %105 = vmatpush.msra.mxu0 %v70_v27 }
  0x2e   :  { %109 = vmatmul.f32.vlgmr.msra.gmra.mxu2 %v69_v28  ;;  %106 = vmatmul.f32.vlgmr.msra.gmra.mxu0 %v68_v29 }
  0x2f   :  { %212 = vmatpush.msra.mxu3 %v116_v32  ;;  %149 = vmatpush.msra.mxu1 %v116_v32 }
  0x31   :  { %213 = vmatpush.msra.mxu3 %v115_v33  ;;  %150 = vmatpush.msra.mxu1 %v115_v33 }
  0xab   :  { %v107_v35 = vpop.f32.mrf.mxu0 }
  0xac   :  { %v108_v36 = vadd.f32 %v220_v34, %v107_v35 }
  0xae   :  { %v113_v37 = vmax.f32 %v108_v36, 0.0 }
  0xb0   :  { %151 = vmatmul.f32.vlgmr.msra.gmra.mxu1 %v113_v37 }
  0xb1   :  { %v110_v38 = vpop.f32.mrf.mxu2 }
  0xb2   :  { %v111_v39 = vadd.f32 %v220_v34, %v110_v38 }
  0xb4   :  { %v114_v40 = vmax.f32 %v111_v39, 0.0 }
  0xb6   :  { %154 = vmatmul.f32.vlgmr.msra.gmra.mxu3 %v114_v40 }
 0x12d   :  { %v152_v42 = vpop.f32.mrf.mxu1 }
 0x12e   :  { %v153_v43 = vadd.f32 %v221_v41, %v152_v42 }
 0x130   :  { %v158_v44 = vadd.f32 %v153_v43, %v68_v29 }
 0x132   :  { %160 = vst [vmem:[#allocation8] sm:$0xff] %v158_v44 }
 0x139   :  { %v155_v45 = vpop.f32.mrf.mxu3 }
 0x13a   :  { %v156_v46 = vadd.f32 %v221_v41, %v155_v45 }
 0x13c   :  { %v159_v47 = vadd.f32 %v156_v46, %v69_v28 }
 0x13e   :  { %161 = vst [vmem:[#allocation8 + $0x8] sm:$0xff] %v159_v47 }
 0x13f   :  { %174 = dma.vmem_to_hbm [thread:$0]  %s167_s12, 256, %s169_s14, [#allocation4], %s325_s26, %s325_s26, %s326_s27  }
 0x140   :  { %322 = dma.done.wait [#allocation4], 256  }
 0x141   :  { %323 = vsyncadd [#allocation4], 4294967040 }
 0x142   :  { %179 = vsyncpa [#allocation3], 1 }
 0x143   :  { %180 = vsyncpa [#allocation6], 1 }
 0x144   :  { %181 = vsyncpa [#allocation4], 1 }

</bundles_post_ra>
